<compile_context>
chip_gen: v6e
topology: v6e:2x2x1
jax: 0.10.0
libtpu: 0.0.40
codegen_flags: <defaults>
</compile_context>

<pallas_src>
import jax
import jax.numpy as jnp
from jax.experimental import pallas as pl
from jax.experimental.pallas import tpu as pltpu


def _round_up(x, m):
    return (x + m - 1) // m * m


def _l2_normalize(x):
    # F.normalize(dim=1, eps=1e-12): x / max(||x||, eps)
    nrm = jnp.sqrt(jnp.sum(x * x, axis=1, keepdims=True))
    return x / jnp.maximum(nrm, 1e-12)


_PALLAS_MIN_ROWS = 1024  # below this, padding + launch overhead dominates -> plain JAX


def _pick_tm():
    """Row-tile size: 256 fills the v6e/v7x 256x256 MXU; 128 matches v5e's 128x128."""
    try:
        kind = jax.devices()[0].device_kind.lower()
        if "v5" in kind:
            return 128
    except Exception:
        pass
    return 256


# ----------------------------------------------------------------------------
# NT-Xent (SimCLR) loss: exact semantics of the torch reference
#   z1,z2 (N,D) -> normalize -> rep=(2N,D) -> sim=rep@rep.T/temp -> CE(mean)
#   (diagonal is NOT masked, matching the reference code)
# ----------------------------------------------------------------------------
def nt_xent_pallas(z1, z2, temperature=0.1):
    N, D = z1.shape
    M2 = 2 * N
    inv_t = 1.0 / float(temperature)

    # normalize in f32, round to bf16 once; the positive-pair target logit is computed
    # from the SAME bf16-rounded rows so it matches the in-kernel matmul closely.
    z1n = _l2_normalize(z1.astype(jnp.float32)).astype(jnp.bfloat16)
    z2n = _l2_normalize(z2.astype(jnp.float32)).astype(jnp.bfloat16)
    rep = jnp.concatenate([z1n, z2n], axis=0)                              # (2N, D) bf16
    pos = jnp.sum(z1n.astype(jnp.float32) * z2n.astype(jnp.float32), axis=1) * inv_t
    tgt = jnp.concatenate([pos, pos], axis=0)                              # (2N,) f32

    TM = _pick_tm()
    Dp = _round_up(max(D, 128), 128)
    Mp = _round_up(M2, TM)          # row/col count padded to a multiple of the row tile
    has_pad = Mp != M2

    TN = TM                          # column tile; TM always divides Mp
    for cand in (2048, 1024, 512, 256):
        if cand >= TM and Mp % cand == 0:
            TN = cand
            break
    n_row = Mp // TM
    n_col = Mp // TN

    rep_p = jnp.zeros((Mp, Dp), jnp.bfloat16).at[:M2, :D].set(rep)         # lhs layout (Mp, Dp)
    rep_t = rep_p.T                                                        # rhs layout (Dp, Mp)
    tgt_p = jnp.zeros((Mp, 1), jnp.float32).at[:M2, 0].set(tgt)

    bias_p = None
    if has_pad:
        # additive column mask: 0 for valid columns, -1e30 for padded columns
        col = jnp.arange(Mp)
        bias_p = jnp.where(col < M2, 0.0, -1e30).astype(jnp.float32).reshape(1, Mp)

    def _body(lhs_ref, rhsT_ref, tgt_ref, o_ref, sum_ref, bias_ref=None):
        i = pl.program_id(0)
        j = pl.program_id(1)

        @pl.when(j == 0)
        def _():
            sum_ref[...] = jnp.zeros_like(sum_ref)

        lhs = lhs_ref[...] * inv_t                      # (TM, Dp) bf16 (weak-typed scale)
        sim = jnp.dot(lhs, rhsT_ref[...],
                      preferred_element_type=jnp.float32)   # (TM, TN) == logits / temp
        if bias_ref is not None:
            sim = sim + bias_ref[...]                   # (1, TN) broadcast pad mask
        # unit-norm rows -> sim <= inv_t (+ tiny bf16 slack): constant shift is stable
        sum_ref[...] += jnp.sum(jnp.exp(sim - inv_t), axis=1, keepdims=True)

        @pl.when(j == pl.num_programs(1) - 1)
        def _():
            lse = inv_t + jnp.log(sum_ref[...])          # (TM, 1)
            per_row = lse - tgt_ref[...]                 # per-row cross entropy
            if has_pad:
                gid = jax.lax.broadcasted_iota(jnp.int32, (TM, 1), 0) + i * TM
                per_row = jnp.where(gid < M2, per_row, 0.0)
            o_ref[...] = jnp.broadcast_to(jnp.sum(per_row), (8, 128))

    if has_pad:
        def kernel(lhs_ref, rhsT_ref, bias_ref, tgt_ref, o_ref, sum_ref):
            _body(lhs_ref, rhsT_ref, tgt_ref, o_ref, sum_ref, bias_ref)
        in_specs = [
            pl.BlockSpec((TM, Dp), lambda i, j: (i, 0)),   # lhs row tile
            pl.BlockSpec((Dp, TN), lambda i, j: (0, j)),   # pre-transposed rhs col tile
            pl.BlockSpec((1, TN), lambda i, j: (0, j)),    # column pad bias
            pl.BlockSpec((TM, 1), lambda i, j: (i, 0)),    # positive-pair logits
        ]
        operands = (rep_p, rep_t, bias_p, tgt_p)
    else:
        def kernel(lhs_ref, rhsT_ref, tgt_ref, o_ref, sum_ref):
            _body(lhs_ref, rhsT_ref, tgt_ref, o_ref, sum_ref)
        in_specs = [
            pl.BlockSpec((TM, Dp), lambda i, j: (i, 0)),
            pl.BlockSpec((Dp, TN), lambda i, j: (0, j)),
            pl.BlockSpec((TM, 1), lambda i, j: (i, 0)),
        ]
        operands = (rep_p, rep_t, tgt_p)

    out = pl.pallas_call(
        kernel,
        out_shape=jax.ShapeDtypeStruct((n_row * 8, 128), jnp.float32),
        grid=(n_row, n_col),
        in_specs=in_specs,
        out_specs=pl.BlockSpec((8, 128), lambda i, j: (i, 0)),
        scratch_shapes=[pltpu.VMEM((TM, 1), jnp.float32)],       # running sum(exp(.))
        compiler_params=pltpu.CompilerParams(
            dimension_semantics=("parallel", "arbitrary"),
            vmem_limit_bytes=32 * 1024 * 1024),
    )(*operands)

    partials = out[::8, 0]                               # one scalar per row tile
    return jnp.sum(partials) / M2                        # cross_entropy mean reduction


def nt_xent_jax(z1, z2, temperature=0.1):
    # small-problem path (launch/padding overhead would dominate a Pallas call)
    z1n = _l2_normalize(z1.astype(jnp.float32))
    z2n = _l2_normalize(z2.astype(jnp.float32))
    rep = jnp.concatenate([z1n, z2n], axis=0)
    sim = (rep @ rep.T) / temperature
    N = z1.shape[0]
    labels = jnp.concatenate([jnp.arange(N) + N, jnp.arange(N)])
    logp = jax.nn.log_softmax(sim, axis=1)
    return -jnp.mean(jnp.take_along_axis(logp, labels[:, None], axis=1))


def nt_xent(z1, z2, temperature=0.1):
    if 2 * z1.shape[0] >= _PALLAS_MIN_ROWS:
        return nt_xent_pallas(z1, z2, temperature)
    return nt_xent_jax(z1, z2, temperature)


# ----------------------------------------------------------------------------
# Segmentation loss kernel: BCE-with-logits (mean), optional elementwise weight.
# (the torch module takes `seg_loss` as an injected module; this deterministic
#  synthetic stand-in is implemented in Pallas)
# ----------------------------------------------------------------------------
def bce_with_logits_pallas(logits, targets, weight=None):
    P = logits.size
    x = logits.reshape(-1)
    y = targets.reshape(-1)

    W = 1024                                   # lane-dense last dim (multiple of 128)
    R = pl.cdiv(P, W)
    TR = 512 if R >= 512 else _round_up(R, 8)  # up to ~1 MiB bf16 tiles
    Rp = _round_up(R, TR)
    Pp = Rp * W
    n_steps = Rp // TR
    need_pad = Pp != P

    # stream in bf16, upcast in kernel. Pad (only when needed) with values whose BCE
    # contribution is exactly 0: max(x,0)=0, x*y=0, log(1+exp(-|x|))=0 for x=-1e4, y=0.
    if need_pad:
        xp = jnp.full((Pp,), -1e4, jnp.bfloat16).at[:P].set(x.astype(jnp.bfloat16)).reshape(Rp, W)
        yp = jnp.zeros((Pp,), jnp.bfloat16).at[:P].set(y.astype(jnp.bfloat16)).reshape(Rp, W)
    else:
        xp = x.astype(jnp.bfloat16).reshape(Rp, W)
        yp = y.astype(jnp.bfloat16).reshape(Rp, W)

    def _bce(xx, yy):
        # log1p-free formulation: exp(-|x|) <= 1 so plain log(1 + t) is exact enough
        return jnp.maximum(xx, 0.0) - xx * yy + jnp.log(1.0 + jnp.exp(-jnp.abs(xx)))

    if weight is None:
        def kernel(x_ref, y_ref, o_ref):
            v = _bce(x_ref[...].astype(jnp.float32), y_ref[...].astype(jnp.float32))
            o_ref[...] = jnp.broadcast_to(jnp.sum(v), (8, 128))
        operands = (xp, yp)
        n_in = 2
    else:
        w = weight.reshape(-1)
        if need_pad:
            wp = jnp.zeros((Pp,), jnp.bfloat16).at[:P].set(w.astype(jnp.bfloat16)).reshape(Rp, W)
        else:
            wp = w.astype(jnp.bfloat16).reshape(Rp, W)

        def kernel(x_ref, y_ref, w_ref, o_ref):
            v = _bce(x_ref[...].astype(jnp.float32), y_ref[...].astype(jnp.float32))
            o_ref[...] = jnp.broadcast_to(jnp.sum(v * w_ref[...].astype(jnp.float32)), (8, 128))
        operands = (xp, yp, wp)
        n_in = 3

    in_specs = [pl.BlockSpec((TR, W), lambda i: (i, 0)) for _ in range(n_in)]
    out = pl.pallas_call(
        kernel,
        out_shape=jax.ShapeDtypeStruct((n_steps * 8, 128), jnp.float32),
        grid=(n_steps,),
        in_specs=in_specs,
        out_specs=pl.BlockSpec((8, 128), lambda i: (i, 0)),   # independent partials
        compiler_params=pltpu.CompilerParams(
            dimension_semantics=("parallel",),
            vmem_limit_bytes=32 * 1024 * 1024),
    )(*operands)
    return jnp.sum(out[::8, 0]) / P


# ----------------------------------------------------------------------------
# MultiLevelLoss
# ----------------------------------------------------------------------------
def _adaptive_avg_pool2d_64(p):
    # exact adaptive_avg_pool2d to (64,64) for spatial dims divisible by 64
    # TODO(synk): non-divisible adaptive pooling bins are not implemented.
    B, C, H, W = p.shape
    assert H % 64 == 0 and W % 64 == 0
    return p.reshape(B, C, 64, H // 64, 64, W // 64).mean(axis=(3, 5))


class MultiLevelLossPallas:
    def __init__(self, seg_loss=None, lambda_p=1.0, lambda_r=0.5, lambda_g=0.5,
                 temperature=0.1):
        self.seg_loss = seg_loss if seg_loss is not None else bce_with_logits_pallas
        self.lambda_p = lambda_p
        self.lambda_r = lambda_r
        self.lambda_g = lambda_g
        self.temp = temperature

    def __call__(self, outputs1, outputs2, mask, weight=None, perm_key=None):
        if perm_key is None:
            perm_key = jax.random.PRNGKey(1234)
        logits1, g1, r1, p1 = outputs1
        _, g2, r2, p2 = outputs2

        seg = self.seg_loss(logits1, mask, weight)
        loss_g = nt_xent(g1, g2, self.temp)

        # r: (B,C,H,W) -> flatten(2) -> permute(0,2,1) -> (B*H*W, C)
        B, Cr, Hr, Wr = r1.shape
        r1_f = jnp.transpose(r1.reshape(B, Cr, Hr * Wr), (0, 2, 1)).reshape(-1, Cr)
        r2_f = jnp.transpose(r2.reshape(B, Cr, Hr * Wr), (0, 2, 1)).reshape(-1, Cr)
        loss_r = nt_xent(r1_f, r2_f, self.temp)

        # p: adaptive_avg_pool2d -> (B,C,64,64) -> (B,4096,C) -> sample 1024 positions
        Cp = p1.shape[1]
        p1_ds = jnp.transpose(_adaptive_avg_pool2d_64(p1).reshape(B, Cp, 4096), (0, 2, 1))
        p2_ds = jnp.transpose(_adaptive_avg_pool2d_64(p2).reshape(B, Cp, 4096), (0, 2, 1))
        # torch.randperm replaced by deterministic jax.random.permutation
        idx = jax.random.permutation(perm_key, 4096)[:1024]
        p1_f = p1_ds[:, idx, :].reshape(-1, Cp)
        p2_f = p2_ds[:, idx, :].reshape(-1, Cp)
        loss_p = nt_xent(p1_f, p2_f, self.temp)

        total = (seg + self.lambda_p * loss_p + self.lambda_r * loss_r
                 + self.lambda_g * loss_g)
        return total, seg, loss_p, loss_r, loss_g


if __name__ == "__main__":
    key = jax.random.PRNGKey(0)
    ks = jax.random.split(key, 10)
    B = 2

    # outputs of the (synthetic) multi-level encoder for two augmented views
    logits1 = jax.random.normal(ks[0], (B, 1, 128, 128), jnp.float32)
    mask = (jax.random.uniform(ks[1], (B, 1, 128, 128)) > 0.5).astype(jnp.float32)
    g1 = jax.random.normal(ks[2], (B, 32), jnp.float32)
    g2 = jax.random.normal(ks[3], (B, 32), jnp.float32)
    r1 = jax.random.normal(ks[4], (B, 16, 8, 8), jnp.float32)
    r2 = jax.random.normal(ks[5], (B, 16, 8, 8), jnp.float32)
    p1 = jax.random.normal(ks[6], (B, 8, 128, 128), jnp.float32)
    p2 = jax.random.normal(ks[7], (B, 8, 128, 128), jnp.float32)

    loss_fn = MultiLevelLossPallas(lambda_p=1.0, lambda_r=0.5, lambda_g=0.5,
                                   temperature=0.1)
    total, seg, lp, lr, lg = loss_fn((logits1, g1, r1, p1),
                                     (None, g2, r2, p2),
                                     mask, weight=None, perm_key=ks[8])
    jax.block_until_ready(total)
    print("KERNEL_OK")
</pallas_src>

<mosaic_0001>
module attributes {stable_mosaic.version = 11 : i64} {
  func.func @kernel(%arg0: i32, %arg1: memref<32x1024xbf16, #tpu.memory_space<vmem>>, %arg2: memref<32x1024xbf16, #tpu.memory_space<vmem>>, %arg3: memref<8x128xf32, #tpu.memory_space<vmem>>) attributes {dimension_semantics = [#tpu.dimension_semantics<parallel>], iteration_bounds = array<i64: 1>, scalar_prefetch = 0 : i64, scratch_operands = 0 : i64, tpu.core_type = #tpu.core_type<tc>, window_params = [{transform_indices = @transform_0, window_bounds = array<i64: 32, 1024>}, {transform_indices = @transform_1, window_bounds = array<i64: 32, 1024>}, {transform_indices = @transform_2, window_bounds = array<i64: 8, 128>}]} {
    %c0 = arith.constant 0 : index
    %c0_0 = arith.constant 0 : index
    %0 = vector.load %arg1[%c0, %c0_0] : memref<32x1024xbf16, #tpu.memory_space<vmem>>, vector<32x1024xbf16>
    %1 = arith.extf %0 : vector<32x1024xbf16> to vector<32x1024xf32>
    %c0_1 = arith.constant 0 : index
    %c0_2 = arith.constant 0 : index
    %2 = vector.load %arg2[%c0_1, %c0_2] : memref<32x1024xbf16, #tpu.memory_space<vmem>>, vector<32x1024xbf16>
    %3 = arith.extf %2 : vector<32x1024xbf16> to vector<32x1024xf32>
    %cst = arith.constant 0.000000e+00 : f32
    %4 = vector.broadcast %cst : f32 to vector<32x1024xf32>
    %5 = arith.maximumf %1, %4 : vector<32x1024xf32>
    %6 = arith.mulf %1, %3 : vector<32x1024xf32>
    %7 = arith.subf %5, %6 : vector<32x1024xf32>
    %8 = math.absf %1 : vector<32x1024xf32>
    %cst_3 = arith.constant 0.000000e+00 : f32
    %9 = vector.broadcast %cst_3 : f32 to vector<32x1024xf32>
    %10 = arith.subf %9, %8 : vector<32x1024xf32>
    %11 = math.exp %10 : vector<32x1024xf32>
    %cst_4 = arith.constant 1.000000e+00 : f32
    %12 = vector.broadcast %cst_4 : f32 to vector<32x1024xf32>
    %13 = arith.addf %12, %11 : vector<32x1024xf32>
    %14 = math.log %13 : vector<32x1024xf32>
    %15 = arith.addf %7, %14 : vector<32x1024xf32>
    %16 = vector.shape_cast %15 : vector<32x1024xf32> to vector<1x32x1024xf32>
    %cst_5 = arith.constant dense<0.000000e+00> : vector<1xf32>
    %17 = vector.multi_reduction <add>, %16, %cst_5 [1, 2] : vector<1x32x1024xf32> to vector<1xf32>
    %18 = vector.shape_cast %17 : vector<1xf32> to vector<1x1x1xf32>
    %19 = vector.extract %18[0, 0, 0] : f32 from vector<1x1x1xf32>
    %20 = vector.broadcast %19 : f32 to vector<8x128xf32>
    %c0_6 = arith.constant 0 : index
    %c0_7 = arith.constant 0 : index
    %21 = vector.load %arg3[%c0_6, %c0_7] : memref<8x128xf32, #tpu.memory_space<vmem>>, vector<8x128xf32>
    tpu.vector_store %arg3[%c0_6, %c0_7], %20 {strides = array<i32>} : memref<8x128xf32, #tpu.memory_space<vmem>>, vector<8x128xf32>,
    return
  }
  func.func @transform_0(%arg0: i32) -> (i32, i32) {
    %c0_i32 = arith.constant 0 : i32
    %c0_i32_0 = arith.constant 0 : i32
    return %arg0, %c0_i32 : i32, i32
  }
  func.func @transform_1(%arg0: i32) -> (i32, i32) {
    %c0_i32 = arith.constant 0 : i32
    %c0_i32_0 = arith.constant 0 : i32
    return %arg0, %c0_i32 : i32, i32
  }
  func.func @transform_2(%arg0: i32) -> (i32, i32) {
    %c0_i32 = arith.constant 0 : i32
    %c0_i32_0 = arith.constant 0 : i32
    return %arg0, %c0_i32 : i32, i32
  }
}

</mosaic_0001>

<bundles_post_ra>
// kernel: tpu_custom_call.1
= control target key start
LH: loop header
LB: loop body
LE: loop exit
PB: predicated region body
PF: predicated region fallthrough
CT: control target
= control target key end

     0   :  { %7 = vsyncpa [#allocation3], 0  ;;  %s1116_s0 = inlined_call_operand.hbm [shape: bf16[32,1024], index: 0, kind: input, shape index: {}]   ;;  %s1117_s1 = inlined_call_operand.hbm [shape: bf16[32,1024], index: 1, kind: input, shape index: {}]   ;;  %s1118_s2 = inlined_call_operand.hbm [shape: f32[8,128], index: 2, kind: output, shape index: {}]  }
   0x1   :  { %8 = vsyncpa [#allocation6], 0 }
   0x2   :  { %9 = vsyncpa [#allocation4], 0  ;;  %s747_s9 = smov [#allocation2]  }
   0x3   :  { %s15_s10 = sshll.u32 %s747_s9, 4  ;;  %s16_s10 = int_to_ptr.vmem [resolvable:$true] %s15_s10 }
   0x4   :  { %s689_s11 = scalar_lea.vmem %s16_s10, 2048  ;;  %p694_p1 = scmp.lt.s32.totalorder %s16_s10, %s16_s10 }
   0x5   :  { %p690_p0 = scmp.ne.s32.totalorder %s16_s10, %s689_s11  ;;  %p695_p2 = scmp.lt.s32.totalorder %s689_s11, %s689_s11 }
   0x7   :  { %p696_p3 = por %p695_p2, %p694_p1 }
   0x9   :  { %p697_p4 = pnand %p696_p3, %p690_p0 }
   0xb   :  { %700 = shalt.err (!%p697_p4)
}
   0xc   :  { %s748_s12 = smov 512   ;;  %s749_s13 = smov 32  }
   0xd   :  { %21 = dma.hbm_to_vmem [thread:$0]  %s1116_s0, 2048, %s16_s10, [#allocation3], %s748_s12, %s748_s12, %s749_s13  }
   0xe   :  { %s750_s16 = smov [#allocation5]  }
   0xf   :  { %s27_s17 = sshll.u32 %s750_s16, 4  ;;  %s28_s17 = int_to_ptr.vmem [resolvable:$true] %s27_s17 }
  0x10   :  { %s709_s18 = scalar_lea.vmem %s28_s17, 2048  ;;  %p714_p6 = scmp.lt.s32.totalorder %s28_s17, %s28_s17 }
  0x11   :  { %p710_p5 = scmp.ne.s32.totalorder %s28_s17, %s709_s18  ;;  %p715_p7 = scmp.lt.s32.totalorder %s709_s18, %s709_s18 }
  0x13   :  { %p716_p8 = por %p715_p7, %p714_p6 }
  0x15   :  { %p717_p9 = pnand %p716_p8, %p710_p5 }
  0x17   :  { %720 = shalt.err (!%p717_p9)
}
  0x18   :  { %33 = dma.hbm_to_vmem [thread:$0]  %s1117_s1, 2048, %s28_s17, [#allocation6], %s748_s12, %s748_s12, %s749_s13  }
  0x19   :  { %741 = dma.done.wait [#allocation3], 2048  }
  0x1a   :  { %742 = vsyncadd [#allocation3], 4294965248 }
  0x1b   :  { %743 = dma.done.wait [#allocation6], 2048  }
  0x1c   :  { %744 = vsyncadd [#allocation6], 4294965248  ;;  %v40_v0 = vld [vmem:[#allocation2] sm:$0xff]  ;;  %v41_v1 = vld [vmem:[#allocation2 + $0x8] sm:$0xff]  ;;  %s751_s0 = smov [#allocation7]  }
  0x1d   :  { %v42_v2 = vld [vmem:[#allocation2 + $0x10] sm:$0xff]  ;;  %v43_v3 = vld [vmem:[#allocation2 + $0x18] sm:$0xff]  ;;  %v44_v4 = vld [vmem:[#allocation2 + $0x20] sm:$0xff]  ;;  %v773_v7 = vunpack.c.l.bf16 %v40_v0  ;;  %v775_v10 = vunpack.c.h.bf16 %v40_v0  ;;  %v777_v11 = vunpack.c.l.bf16 %v41_v1  ;;  %v779_v12 = vunpack.c.h.bf16 %v41_v1  ;;  %s536_s1 = sshll.u32 %s751_s0, 4  ;;  %s537_s1 = int_to_ptr.vmem [resolvable:$true] %s536_s1 }
  0x1e   :  { %v45_v5 = vld [vmem:[#allocation2 + $0x28] sm:$0xff]  ;;  %v46_v6 = vld [vmem:[#allocation2 + $0x30] sm:$0xff]  ;;  %v47_v8 = vld [vmem:[#allocation2 + $0x38] sm:$0xff]  ;;  %v781_v13 = vunpack.c.l.bf16 %v42_v2  ;;  %v783_v16 = vunpack.c.h.bf16 %v42_v2  ;;  %v785_v17 = vunpack.c.l.bf16 %v43_v3  ;;  %v787_v18 = vunpack.c.h.bf16 %v43_v3  ;;  %s721_s22 = scalar_lea.vmem %s537_s1, 128  ;;  %p726_p11 = scmp.lt.s32.totalorder %s537_s1, %s537_s1 }
  0x1f   :  { %v48_v9 = vld [vmem:[#allocation2 + $0x40] sm:$0xff]  ;;  %v49_v14 = vld [vmem:[#allocation2 + $0x48] sm:$0xff]  ;;  %v50_v15 = vld [vmem:[#allocation2 + $0x50] sm:$0xff]  ;;  %v789_v19 = vunpack.c.l.bf16 %v44_v4  ;;  %v791_v22 = vunpack.c.h.bf16 %v44_v4  ;;  %v793_v23 = vunpack.c.l.bf16 %v45_v5  ;;  %v795_v24 = vunpack.c.h.bf16 %v45_v5  ;;  %p722_p10 = scmp.ne.s32.totalorder %s537_s1, %s721_s22  ;;  %p727_p12 = scmp.lt.s32.totalorder %s721_s22, %s721_s22 }
  0x20   :  { %v51_v20 = vld [vmem:[#allocation2 + $0x58] sm:$0xff]  ;;  %v52_v21 = vld [vmem:[#allocation2 + $0x60] sm:$0xff]  ;;  %v797_v25 = vunpack.c.l.bf16 %v46_v6  ;;  %v53_v26 = vld [vmem:[#allocation2 + $0x68] sm:$0xff]  ;;  %v799_v28 = vunpack.c.h.bf16 %v46_v6  ;;  %v801_v29 = vunpack.c.l.bf16 %v47_v8  ;;  %v803_v30 = vunpack.c.h.bf16 %v47_v8 }
  0x21   :  { %v54_v27 = vld [vmem:[#allocation2 + $0x70] sm:$0xff]  ;;  %v805_v31 = vunpack.c.l.bf16 %v48_v9  ;;  %v55_v32 = vld [vmem:[#allocation2 + $0x78] sm:$0xff]  ;;  %v807_v33 = vunpack.c.h.bf16 %v48_v9  ;;  %v809_v34 = vunpack.c.l.bf16 %v49_v14  ;;  %v811_v35 = vunpack.c.h.bf16 %v49_v14  ;;  %v815_v37 = vld [vmem:[#allocation5] sm:$0xff]  ;;  %p728_p13 = por %p727_p12, %p726_p11 }
  0x22   :  { %v813_v36 = vunpack.c.l.bf16 %v50_v15  ;;  %v817_v38 = vunpack.c.h.bf16 %v50_v15  ;;  %v819_v39 = vunpack.c.l.bf16 %v51_v20  ;;  %v821_v40 = vunpack.c.h.bf16 %v51_v20  ;;  %v825_v42 = vld [vmem:[#allocation5 + $0x8] sm:$0xff]  ;;  %v827_v43 = vld [vmem:[#allocation5 + $0x10] sm:$0xff]  ;;  %v837_v48 = vld [vmem:[#allocation5 + $0x18] sm:$0xff] }
  0x23   :  { %1143 = vst [vmem:[#allocation11_spill] sm:$0xff] %v805_v31  ;;  %1144 = vst [vmem:[#allocation12_spill] sm:$0xff] %v807_v33  ;;  %v823_v41 = vunpack.c.l.bf16 %v52_v21  ;;  %v829_v44 = vunpack.c.h.bf16 %v52_v21  ;;  %v831_v45 = vunpack.c.l.bf16 %v53_v26  ;;  %v833_v46 = vunpack.c.h.bf16 %v53_v26  ;;  %v839_v49 = vld [vmem:[#allocation5 + $0x20] sm:$0xff]  ;;  %v847_v53 = vld [vmem:[#allocation5 + $0x28] sm:$0xff]  ;;  %p729_p0 = pnand %p728_p13, %p722_p10 }
  0x24   :  { %1145 = vst [vmem:[#allocation13_spill] sm:$0xff] %v809_v34  ;;  %v835_v47 = vunpack.c.l.bf16 %v54_v27  ;;  %v841_v50 = vunpack.c.h.bf16 %v54_v27  ;;  %v843_v51 = vunpack.c.l.bf16 %v55_v32  ;;  %v845_v52 = vunpack.c.h.bf16 %v55_v32  ;;  %v850_v55 = vld [vmem:[#allocation5 + $0x30] sm:$0xff]  ;;  %v852_v56 = vld [vmem:[#allocation5 + $0x38] sm:$0xff]  ;;  %v858_v61 = vld [vmem:[#allocation5 + $0x40] sm:$0xff] }
  0x25   :  { %1146 = vst [vmem:[#allocation14_spill] sm:$0xff] %v833_v46  ;;  %1150 = vst [vmem:[#allocation18_spill] sm:$0xff] %v858_v61  ;;  %v864_v2 = vld [vmem:[#allocation5 + $0x48] sm:$0xff]  ;;  %v866_v3 = vld [vmem:[#allocation5 + $0x50] sm:$0xff]  ;;  %v232_v8 = vand.u32 2147483647, %v773_v7 }
  0x26   :  { %1147 = vst [vmem:[#allocation15_spill] sm:$0xff] %v835_v47  ;;  %1148 = vst [vmem:[#allocation16_spill] sm:$0xff] %v841_v50  ;;  %v872_v9 = vld [vmem:[#allocation5 + $0x58] sm:$0xff]  ;;  %v233_v21 = vand.u32 2147483647, %v775_v10  ;;  %v878_v26 = vld [vmem:[#allocation5 + $0x60] sm:$0xff] }
  0x27   :  { %1149 = vst [vmem:[#allocation17_spill] sm:$0xff] %v843_v51  ;;  %1151 = vst [vmem:[#allocation19_spill] sm:$0xff] %v864_v2  ;;  %v234_v5 = vand.u32 2147483647, %v777_v11  ;;  %v235_v20 = vand.u32 2147483647, %v779_v12 }
  0x28   :  { %1152 = vst [vmem:[#allocation20_spill] sm:$0xff] %v866_v3  ;;  %1153 = vst [vmem:[#allocation21_spill] sm:$0xff] %v872_v9  ;;  %v236_v27 = vand.u32 2147483647, %v781_v13  ;;  %v264_v63 = vsub.f32 0.0, %v232_v8  ;;  %v265_v4 = vsub.f32 0.0, %v233_v21 }
  0x29   :  { %1154 = vst [vmem:[#allocation22_spill] sm:$0xff] %v878_v26  ;;  %v237_v62 = vand.u32 2147483647, %v783_v16  ;;  %v238_v60 = vand.u32 2147483647, %v785_v17  ;;  %v266_v59 = vsub.f32 0.0, %v234_v5 }
  0x2a   :  { %v239_v8 = vand.u32 2147483647, %v787_v18  ;;  %v267_v58 = vsub.f32 0.0, %v235_v20  ;;  %v268_v57 = vsub.f32 0.0, %v236_v27  ;;  %v296_v21 = vmul.f32 1.442695, %v264_v63 }
  0x2b   :  { %v240_v15 = vand.u32 2147483647, %v789_v19  ;;  %v269_v54 = vsub.f32 0.0, %v237_v62  ;;  %v298_v26 = vmul.f32 1.442695, %v265_v4  ;;  %v270_v0 = vsub.f32 0.0, %v238_v60 }
  0x2c   :  { %v300_v9 = vmul.f32 1.442695, %v266_v59  ;;  %v241_v32 = vand.u32 2147483647, %v791_v22  ;;  %v271_v3 = vsub.f32 0.0, %v239_v8  ;;  %553 = vpow2.f32 %v296_v21 }
  0x2d   :  { %v302_v6 = vmul.f32 1.442695, %v267_v58  ;;  %v242_v27 = vand.u32 2147483647, %v793_v23  ;;  %v304_v14 = vmul.f32 1.442695, %v268_v57  ;;  %555 = vpow2.f32 %v298_v26 }
  0x2e   :  { %v243_v62 = vand.u32 2147483647, %v795_v24  ;;  %v272_v4 = vsub.f32 0.0, %v240_v15  ;;  %v306_v5 = vmul.f32 1.442695, %v269_v54  ;;  %557 = vpow2.f32 %v300_v9 }
  0x2f   :  { %v244_v59 = vand.u32 2147483647, %v797_v25  ;;  %v308_v20 = vmul.f32 1.442695, %v270_v0  ;;  %v245_v8 = vand.u32 2147483647, %v799_v28  ;;  %559 = vpow2.f32 %v302_v6 }
  0x30   :  { %v273_v58 = vsub.f32 0.0, %v241_v32  ;;  %v310_v63 = vmul.f32 1.442695, %v271_v3  ;;  %v246_v57 = vand.u32 2147483647, %v801_v29  ;;  %v274_v21 = vsub.f32 0.0, %v242_v27 }
  0x31   :  { %561 = vpow2.f32 %v304_v14  ;;  %v247_v15 = vand.u32 2147483647, %v803_v30  ;;  %v275_v54 = vsub.f32 0.0, %v243_v62  ;;  %v312_v26 = vmul.f32 1.442695, %v272_v4 }
  0x32   :  { %563 = vpow2.f32 %v306_v5  ;;  %v248_v0 = vand.u32 2147483647, %v805_v31  ;;  %v276_v9 = vsub.f32 0.0, %v244_v59  ;;  %v249_v6 = vand.u32 2147483647, %v807_v33 }
  0x33   :  { %565 = vpow2.f32 %v308_v20  ;;  %v277_v3 = vsub.f32 0.0, %v245_v8  ;;  %v314_v32 = vmul.f32 1.442695, %v273_v58  ;;  %v278_v27 = vsub.f32 0.0, %v246_v57 }
  0x34   :  { %567 = vpow2.f32 %v310_v63  ;;  %v316_v2 = vmul.f32 1.442695, %v274_v21  ;;  %v279_v62 = vsub.f32 0.0, %v247_v15  ;;  %v318_v4 = vmul.f32 1.442695, %v275_v54 }
  0x35   :  { %569 = vpow2.f32 %v312_v26  ;;  %v1155_v59 = vunpack.c.l.bf16 %v815_v37  ;;  %v1156_v8 = vunpack.c.h.bf16 %v815_v37  ;;  %v280_v58 = vsub.f32 0.0, %v248_v0 }
  0x36   :  { %v320_v60 = vmul.f32 1.442695, %v276_v9  ;;  %v1157_v14 = vunpack.c.l.bf16 %v825_v42  ;;  %v281_v21 = vsub.f32 0.0, %v249_v6  ;;  %571 = vpow2.f32 %v314_v32 }
  0x37   :  { %v168_v20 = vmul.f32 %v1155_v59, %v773_v7  ;;  %v169_v63 = vmul.f32 %v1156_v8, %v775_v10  ;;  %v322_v5 = vmul.f32 1.442695, %v277_v3  ;;  %v1158_v15 = vunpack.c.h.bf16 %v825_v42 }
  0x38   :  { %v170_v57 = vmul.f32 %v1157_v14, %v777_v11  ;;  %v1159_v26 = vunpack.c.l.bf16 %v827_v43  ;;  %573 = vpow2.f32 %v316_v2  ;;  %v324_v37 = vmul.f32 1.442695, %v278_v27 }
  0x39   :  { %v171_v54 = vmul.f32 %v1158_v15, %v779_v12  ;;  %v554_v8 = vpop.eup %553  ;;  %v1160_v0 = vunpack.c.h.bf16 %v827_v43  ;;  %v1161_v6 = vunpack.c.l.bf16 %v837_v48  ;;  %575 = vpow2.f32 %v318_v4 }
  0x3a   :  { %v172_v59 = vmul.f32 %v1159_v26, %v781_v13  ;;  %v326_v3 = vmul.f32 1.442695, %v279_v62  ;;  %v556_v14 = vpop.eup %555  ;;  %v1162_v42 = vunpack.c.h.bf16 %v837_v48  ;;  %v1163_v2 = vunpack.c.l.bf16 %v839_v49 }
  0x3b   :  { %v173_v9 = vmul.f32 %v1160_v0, %v783_v16  ;;  %v174_v32 = vmul.f32 %v1161_v6, %v785_v17  ;;  %577 = vpow2.f32 %v320_v60  ;;  %v328_v26 = vmul.f32 1.442695, %v280_v58  ;;  %v558_v1 = vpop.eup %557 }
  0x3c   :  { %v175_v15 = vmul.f32 %v1162_v42, %v787_v18  ;;  %v176_v27 = vmul.f32 %v1163_v2, %v789_v19  ;;  %v1164_v43 = vunpack.c.h.bf16 %v839_v49  ;;  %v1165_v4 = vunpack.c.l.bf16 %v847_v53  ;;  %v560_v48 = vpop.eup %559 }
  0x3d   :  { %579 = vpow2.f32 %v322_v5  ;;  %v330_v6 = vmul.f32 1.442695, %v281_v21  ;;  %v1166_v42 = vunpack.c.h.bf16 %v847_v53  ;;  %v250_v60 = vand.u32 2147483647, %v809_v34 }
  0x3e   :  { %v177_v0 = vmul.f32 %v1164_v43, %v791_v22  ;;  %v956_v62 = vmul.f32 %v1165_v4, %v793_v23  ;;  %581 = vpow2.f32 %v324_v37  ;;  %v360_v58 = vadd.f32 1.0, %v554_v8  ;;  %v562_v2 = vpop.eup %561 }
  0x3f   :  { %v961_v33 = vmul.f32 %v1166_v42, %v795_v24  ;;  %v1167_v49 = vunpack.c.l.bf16 %v850_v55  ;;  %v1168_v5 = vunpack.c.h.bf16 %v850_v55  ;;  %583 = vpow2.f32 %v326_v3  ;;  %v564_v53 = vpop.eup %563 }
  0x40   :  { %v361_v4 = vadd.f32 1.0, %v556_v14  ;;  %v1169_v42 = vmax.f32 %v773_v7, 0.0  ;;  %v251_v37 = vand.u32 2147483647, %v811_v35  ;;  %585 = vpow2.f32 %v328_v26  ;;  %v566_v34 = vpop.eup %565 }
  0x41   :  { %v967_v43 = vmul.f32 %v1167_v49, %v797_v25  ;;  %v972_v21 = vmul.f32 %v1168_v5, %v799_v28  ;;  %v362_v8 = vadd.f32 1.0, %v558_v1  ;;  %v1170_v49 = vmax.f32 %v775_v10, 0.0  ;;  %v568_v14 = vpop.eup %567 }
  0x42   :  { %v976_v61 = vsub.f32 %v1169_v42, %v168_v20  ;;  %v1171_v55 = vmax.f32 %v777_v11, 0.0  ;;  %587 = vpow2.f32 %v330_v6  ;;  %v363_v3 = vadd.f32 1.0, %v560_v48  ;;  %v570_v11 = vpop.eup %569 }
  0x43   :  { %v981_v31 = vsub.f32 %v1170_v49, %v169_v63  ;;  %v252_v7 = vand.u32 2147483647, %v813_v36  ;;  %v282_v20 = vsub.f32 0.0, %v250_v60  ;;  %v364_v42 = vadd.f32 1.0, %v562_v2 }
  0x44   :  { %v985_v5 = vsub.f32 %v1171_v55, %v170_v57  ;;  %589 = vlog2.f32 %v360_v58  ;;  %v1172_v26 = vmax.f32 %v779_v12, 0.0  ;;  %v1173_v10 = vmax.f32 %v781_v13, 0.0  ;;  %v572_v13 = vpop.eup %571 }
  0x45   :  { %v365_v49 = vadd.f32 1.0, %v564_v53  ;;  %591 = vlog2.f32 %v361_v4  ;;  %v253_v57 = vand.u32 2147483647, %v817_v38  ;;  %v283_v6 = vsub.f32 0.0, %v251_v37  ;;  %v574_v55 = vpop.eup %573 }
  0x46   :  { %v990_v1 = vsub.f32 %v1172_v26, %v171_v54  ;;  %v994_v63 = vsub.f32 %v1173_v10, %v172_v59  ;;  %v366_v48 = vadd.f32 1.0, %v566_v34  ;;  %593 = vlog2.f32 %v362_v8 }
  0x47   :  { %v1174_v60 = vmax.f32 %v783_v16, 0.0  ;;  %v1175_v12 = vmax.f32 %v785_v17, 0.0  ;;  %v367_v58 = vadd.f32 1.0, %v568_v14  ;;  %595 = vlog2.f32 %v363_v3 }
  0x48   :  { %v254_v59 = vand.u32 2147483647, %v819_v39  ;;  %v284_v4 = vsub.f32 0.0, %v252_v7  ;;  %v332_v53 = vmul.f32 1.442695, %v282_v20  ;;  %597 = vlog2.f32 %v364_v42 }
  0x49   :  { %v999_v2 = vsub.f32 %v1174_v60, %v173_v9  ;;  %v1003_v54 = vsub.f32 %v1175_v12, %v174_v32  ;;  %v1176_v34 = vmax.f32 %v787_v18, 0.0  ;;  %v1177_v16 = vmax.f32 %v789_v19, 0.0  ;;  %v576_v32 = vpop.eup %575 }
  0x4a   :  { %v368_v17 = vadd.f32 1.0, %v570_v11  ;;  %599 = vlog2.f32 %v365_v49  ;;  %v255_v8 = vand.u32 2147483647, %v821_v40  ;;  %v285_v3 = vsub.f32 0.0, %v253_v57  ;;  %v578_v7 = vpop.eup %577 }
  0x4b   :  { %v1008_v37 = vsub.f32 %v1176_v34, %v175_v15  ;;  %v1012_v9 = vsub.f32 %v1177_v16, %v176_v27  ;;  %v334_v14 = vmul.f32 1.442695, %v283_v6  ;;  %601 = vlog2.f32 %v366_v48  ;;  %v580_v19 = vpop.eup %579 }
  0x4c   :  { %v1178_v20 = vmax.f32 %v791_v22, 0.0  ;;  %v256_v18 = vand.u32 2147483647, %v823_v41  ;;  %v369_v15 = vadd.f32 1.0, %v572_v13  ;;  %603 = vlog2.f32 %v367_v58  ;;  %v582_v49 = vpop.eup %581 }
  0x4d   :  { %v257_v27 = vand.u32 2147483647, %v829_v44  ;;  %v286_v26 = vsub.f32 0.0, %v254_v59  ;;  %605 = vpow2.f32 %v332_v53  ;;  %v336_v10 = vmul.f32 1.442695, %v284_v4  ;;  %v584_v22 = vpop.eup %583 }
  0x4e   :  { %v1017_v42 = vsub.f32 %v1178_v20, %v177_v0  ;;  %v258_v11 = vand.u32 2147483647, %v831_v45  ;;  %v259_v57 = vand.u32 2147483647, %v833_v46  ;;  %v370_v6 = vadd.f32 1.0, %v574_v55  ;;  %v586_v12 = vpop.eup %585 }
  0x4f   :  { %607 = vlog2.f32 %v368_v17  ;;  %v260_v0 = vand.u32 2147483647, %v835_v47  ;;  %v287_v48 = vsub.f32 0.0, %v255_v8  ;;  %v338_v60 = vmul.f32 1.442695, %v285_v3  ;;  %v588_v4 = vpop.eup %587 }
  0x50   :  { %609 = vpow2.f32 %v334_v14  ;;  %v261_v58 = vand.u32 2147483647, %v841_v50  ;;  %v288_v13 = vsub.f32 0.0, %v256_v18  ;;  %v371_v59 = vadd.f32 1.0, %v576_v32 }
  0x51   :  { %611 = vlog2.f32 %v369_v15  ;;  %v262_v53 = vand.u32 2147483647, %v843_v51  ;;  %v289_v34 = vsub.f32 0.0, %v257_v27  ;;  %v340_v16 = vmul.f32 1.442695, %v286_v26  ;;  %v590_v55 = vpop.eup %589 }
  0x52   :  { %613 = vpow2.f32 %v336_v10  ;;  %v290_v20 = vsub.f32 0.0, %v258_v11  ;;  %v372_v47 = vadd.f32 1.0, %v578_v7  ;;  %v592_v8 = vpop.eup %591  ;;  %v291_v3 = vsub.f32 0.0, %v259_v57 }
  0x53   :  { %615 = vlog2.f32 %v370_v6  ;;  %v342_v14 = vmul.f32 1.442695, %v287_v48  ;;  %v393_v50 = vmul.f32 0.6931472, %v590_v55  ;;  %v594_v18 = vpop.eup %593  ;;  %v344_v32 = vmul.f32 1.442695, %v288_v13 }
  0x54   :  { %617 = vpow2.f32 %v338_v60  ;;  %v373_v15 = vadd.f32 1.0, %v580_v19  ;;  %v395_v46 = vmul.f32 0.6931472, %v592_v8  ;;  %v596_v51 = vpop.eup %595  ;;  %v346_v27 = vmul.f32 1.442695, %v289_v34 }
  0x55   :  { %619 = vlog2.f32 %v371_v59  ;;  %v397_v26 = vmul.f32 0.6931472, %v594_v18  ;;  %v456_v10 = vadd.f32 %v393_v50, %v976_v61  ;;  %v598_v17 = vpop.eup %597  ;;  %v374_v11 = vadd.f32 1.0, %v582_v49 }
  0x56   :  { %621 = vpow2.f32 %v340_v16  ;;  %v399_v7 = vmul.f32 0.6931472, %v596_v51  ;;  %v457_v57 = vadd.f32 %v395_v46, %v981_v31  ;;  %v375_v48 = vadd.f32 1.0, %v584_v22 }
  0x57   :  { %623 = vlog2.f32 %v372_v47  ;;  %v600_v6 = vpop.eup %599  ;;  %v401_v60 = vmul.f32 0.6931472, %v598_v17  ;;  %v458_v19 = vadd.f32 %v397_v26, %v985_v5  ;;  %v292_v50 = vsub.f32 0.0, %v260_v0 }
  0x58   :  { %625 = vpow2.f32 %v342_v14  ;;  %v602_v13 = vpop.eup %601  ;;  %v403_v59 = vmul.f32 0.6931472, %v600_v6  ;;  %v459_v34 = vadd.f32 %v399_v7, %v990_v1  ;;  %v488_v16 = vadd.f32 %v457_v57, %v456_v10 }
  0x59   :  { %627 = vlog2.f32 %v373_v15  ;;  %v604_v55 = vpop.eup %603  ;;  %v348_v61 = vmul.f32 1.442695, %v290_v20  ;;  %v376_v51 = vadd.f32 1.0, %v586_v12  ;;  %v405_v49 = vmul.f32 0.6931472, %v602_v13 }
  0x5a   :  { %629 = vpow2.f32 %v344_v32  ;;  %v606_v47 = vpop.eup %605  ;;  %v460_v31 = vadd.f32 %v401_v60, %v994_v63  ;;  %v489_v46 = vadd.f32 %v488_v16, %v458_v19  ;;  %v293_v17 = vsub.f32 0.0, %v261_v58 }
  0x5b   :  { %631 = vlog2.f32 %v374_v11  ;;  %v350_v5 = vmul.f32 1.442695, %v291_v3  ;;  %v377_v8 = vadd.f32 1.0, %v588_v4  ;;  %v407_v18 = vmul.f32 0.6931472, %v604_v55 }
  0x5c   :  { %v608_v22 = vpop.eup %607  ;;  %633 = vpow2.f32 %v346_v27  ;;  %v461_v1 = vadd.f32 %v403_v59, %v999_v2  ;;  %v490_v0 = vadd.f32 %v489_v46, %v459_v34  ;;  %v294_v20 = vsub.f32 0.0, %v262_v53 }
  0x5d   :  { %v610_v14 = vpop.eup %609  ;;  %635 = vlog2.f32 %v375_v48  ;;  %v352_v12 = vmul.f32 1.442695, %v292_v50  ;;  %v378_v15 = vadd.f32 1.0, %v606_v47  ;;  %v409_v10 = vmul.f32 0.6931472, %v608_v22 }
  0x5e   :  { %v612_v32 = vpop.eup %611  ;;  %637 = vpow2.f32 %v348_v61  ;;  %v462_v63 = vadd.f32 %v405_v49, %v1003_v54  ;;  %v491_v58 = vadd.f32 %v490_v0, %v460_v31  ;;  %v1179_v4 = vand.u32 2147483647, %v845_v52 }
  0x5f   :  { %v614_v26 = vpop.eup %613  ;;  %639 = vlog2.f32 %v376_v51  ;;  %v354_v11 = vmul.f32 1.442695, %v293_v17  ;;  %v379_v7 = vadd.f32 1.0, %v610_v14  ;;  %v411_v57 = vmul.f32 0.6931472, %v612_v32 }
  0x60   :  { %v616_v27 = vpop.eup %615  ;;  %v295_v3 = vsub.f32 0.0, %v1179_v4  ;;  %641 = vpow2.f32 %v350_v5  ;;  %v463_v53 = vadd.f32 %v407_v18, %v1008_v37  ;;  %v492_v6 = vadd.f32 %v491_v58, %v461_v1 }
  0x61   :  { %v618_v2 = vpop.eup %617  ;;  %643 = vlog2.f32 %v377_v8  ;;  %v1180_v60 = vmax.f32 %v793_v23, 0.0  ;;  %v356_v54 = vmul.f32 1.442695, %v294_v20  ;;  %v380_v13 = vadd.f32 1.0, %v614_v26 }
  0x62   :  { %v620_v48 = vpop.eup %619  ;;  %645 = vpow2.f32 %v352_v12  ;;  %v413_v34 = vmul.f32 0.6931472, %v616_v27  ;;  %v464_v16 = vadd.f32 %v409_v10, %v1012_v9  ;;  %v493_v55 = vadd.f32 %v492_v6, %v462_v63  ;;  %v1186_v63 = vld [vmem:[#allocation11_spill] sm:$0xff]  ;;  %v1187_v27 = vld [vmem:[#allocation18_spill] sm:$0xff]  ;;  %v1190_v6 = vld [vmem:[#allocation12_spill] sm:$0xff] }
  0x63   :  { %v210_v19 = vsub.f32 %v1180_v60, %v956_v62  ;;  %v622_v59 = vpop.eup %621  ;;  %647 = vlog2.f32 %v378_v15  ;;  %v1181_v61 = vmax.f32 %v795_v24, 0.0  ;;  %v358_v51 = vmul.f32 1.442695, %v295_v3 }
  0x64   :  { %v624_v50 = vpop.eup %623  ;;  %649 = vpow2.f32 %v354_v11  ;;  %v381_v47 = vadd.f32 1.0, %v618_v2  ;;  %v415_v23 = vmul.f32 0.6931472, %v620_v48  ;;  %v465_v62 = vadd.f32 %v411_v57, %v1017_v42 }
  0x65   :  { %v211_v37 = vsub.f32 %v1181_v61, %v961_v33  ;;  %v626_v49 = vpop.eup %625  ;;  %651 = vlog2.f32 %v379_v7  ;;  %v494_v31 = vadd.f32 %v493_v55, %v463_v53  ;;  %v1182_v22 = vunpack.c.l.bf16 %v852_v56  ;;  %v1193_v61 = vld [vmem:[#allocation13_spill] sm:$0xff] }
  0x66   :  { %v628_v46 = vpop.eup %627  ;;  %v1183_v17 = vmax.f32 %v797_v25, 0.0  ;;  %653 = vpow2.f32 %v356_v54  ;;  %v382_v24 = vadd.f32 1.0, %v622_v59  ;;  %v417_v8 = vmul.f32 0.6931472, %v624_v50 }
  0x67   :  { %v182_v9 = vmul.f32 %v1182_v22, %v801_v29  ;;  %v630_v33 = vpop.eup %629  ;;  %655 = vlog2.f32 %v380_v13  ;;  %v466_v14 = vadd.f32 %v413_v34, %v210_v19  ;;  %v495_v18 = vadd.f32 %v494_v31, %v464_v16 }
  0x68   :  { %v212_v5 = vsub.f32 %v1183_v17, %v967_v43  ;;  %v632_v1 = vpop.eup %631  ;;  %v1184_v42 = vunpack.c.h.bf16 %v852_v56  ;;  %v1185_v32 = vmax.f32 %v799_v28, 0.0  ;;  %657 = vpow2.f32 %v358_v51  ;;  %v1194_v51 = vld [vmem:[#allocation19_spill] sm:$0xff] }
  0x69   :  { %v383_v12 = vadd.f32 1.0, %v626_v49  ;;  %v634_v25 = vpop.eup %633  ;;  %v419_v43 = vmul.f32 0.6931472, %v628_v46  ;;  %659 = vlog2.f32 %v381_v47  ;;  %v467_v15 = vadd.f32 %v415_v23, %v211_v37 }
  0x6a   :  { %v183_v0 = vmul.f32 %v1184_v42, %v803_v30  ;;  %v213_v20 = vsub.f32 %v1185_v32, %v972_v21  ;;  %v496_v26 = vadd.f32 %v495_v18, %v465_v62  ;;  %v636_v10 = vpop.eup %635  ;;  %v152_v58 = vmax.f32 %v1186_v63, 0.0 }
  0x6b   :  { %v1188_v4 = vunpack.c.l.bf16 %v1187_v27  ;;  %v1189_v56 = vmax.f32 %v801_v29, 0.0  ;;  %v384_v7 = vadd.f32 1.0, %v630_v33  ;;  %v638_v28 = vpop.eup %637  ;;  %v421_v21 = vmul.f32 0.6931472, %v632_v1 }
  0x6c   :  { %661 = vlog2.f32 %v382_v24  ;;  %v468_v2 = vadd.f32 %v417_v8, %v212_v5  ;;  %v497_v57 = vadd.f32 %v496_v26, %v466_v14  ;;  %v640_v53 = vpop.eup %639  ;;  %v153_v48 = vmax.f32 %v1190_v6, 0.0 }
  0x6d   :  { %v184_v3 = vmul.f32 %v1188_v4, %v1186_v63  ;;  %v214_v11 = vsub.f32 %v1189_v56, %v182_v9  ;;  %v1191_v60 = vunpack.c.h.bf16 %v1187_v27  ;;  %v1192_v54 = vmax.f32 %v803_v30, 0.0  ;;  %v642_v34 = vpop.eup %641 }
  0x6e   :  { %v385_v59 = vadd.f32 1.0, %v634_v25  ;;  %v423_v29 = vmul.f32 0.6931472, %v636_v10  ;;  %663 = vlog2.f32 %v383_v12  ;;  %v469_v16 = vadd.f32 %v419_v43, %v213_v20  ;;  %v644_v50 = vpop.eup %643  ;;  %v1197_v20 = vld [vmem:[#allocation20_spill] sm:$0xff] }
  0x6f   :  { %v185_v19 = vmul.f32 %v1191_v60, %v1190_v6  ;;  %v215_v13 = vsub.f32 %v1192_v54, %v183_v0  ;;  %v498_v55 = vadd.f32 %v497_v57, %v467_v15  ;;  %v154_v37 = vmax.f32 %v1193_v61, 0.0  ;;  %v646_v31 = vpop.eup %645  ;;  %v101_v54 = vld [vmem:[#allocation5 + $0x68] sm:$0xff] }
  0x70   :  { %v1195_v47 = vunpack.c.l.bf16 %v1194_v51  ;;  %v216_v23 = vsub.f32 %v152_v58, %v184_v3  ;;  %v386_v62 = vadd.f32 1.0, %v638_v28  ;;  %v425_v46 = vmul.f32 0.6931472, %v640_v53  ;;  %v648_v9 = vpop.eup %647  ;;  %v1200_v53 = vld [vmem:[#allocation21_spill] sm:$0xff] }
  0x71   :  { %665 = vlog2.f32 %v384_v7  ;;  %v470_v30 = vadd.f32 %v421_v21, %v214_v11  ;;  %v499_v22 = vadd.f32 %v498_v55, %v468_v2  ;;  %v155_v17 = vmax.f32 %v811_v35, 0.0  ;;  %v650_v14 = vpop.eup %649 }
  0x72   :  { %v186_v49 = vmul.f32 %v1195_v47, %v1193_v61  ;;  %v1196_v5 = vunpack.c.h.bf16 %v1194_v51  ;;  %v217_v33 = vsub.f32 %v153_v48, %v185_v19  ;;  %v387_v8 = vadd.f32 1.0, %v642_v34  ;;  %v652_v0 = vpop.eup %651 }
  0x73   :  { %v427_v18 = vmul.f32 0.6931472, %v644_v50  ;;  %667 = vlog2.f32 %v385_v59  ;;  %v471_v1 = vadd.f32 %v423_v29, %v215_v13  ;;  %v500_v42 = vadd.f32 %v499_v22, %v469_v16  ;;  %v654_v26 = vpop.eup %653  ;;  %v102_v22 = vld [vmem:[#allocation5 + $0x70] sm:$0xff] }
  0x74   :  { %v187_v24 = vmul.f32 %v1196_v5, %v811_v35  ;;  %v156_v32 = vmax.f32 %v813_v36, 0.0  ;;  %v1198_v12 = vunpack.c.l.bf16 %v1197_v20  ;;  %v218_v43 = vsub.f32 %v154_v37, %v186_v49  ;;  %v656_v58 = vpop.eup %655 }
  0x75   :  { %v388_v15 = vadd.f32 1.0, %v646_v31  ;;  %v429_v10 = vmul.f32 0.6931472, %v648_v9  ;;  %669 = vlog2.f32 %v386_v62  ;;  %v472_v35 = vadd.f32 %v425_v46, %v216_v23  ;;  %v658_v7 = vpop.eup %657  ;;  %v1203_v62 = vld [vmem:[#allocation22_spill] sm:$0xff] }
  0x76   :  { %v188_v25 = vmul.f32 %v1198_v12, %v813_v36  ;;  %v501_v63 = vadd.f32 %v500_v42, %v470_v30  ;;  %v157_v27 = vmax.f32 %v817_v38, 0.0  ;;  %v1199_v4 = vunpack.c.h.bf16 %v1197_v20  ;;  %v660_v2 = vpop.eup %659 }
  0x77   :  { %v219_v56 = vsub.f32 %v155_v17, %v187_v24  ;;  %v389_v11 = vadd.f32 1.0, %v650_v14  ;;  %v431_v28 = vmul.f32 0.6931472, %v652_v0  ;;  %671 = vlog2.f32 %v387_v8 }
  0x78   :  { %v189_v3 = vmul.f32 %v1199_v4, %v817_v38  ;;  %v473_v36 = vadd.f32 %v427_v18, %v217_v33  ;;  %v502_v21 = vadd.f32 %v501_v63, %v471_v1  ;;  %v158_v57 = vmax.f32 %v819_v39, 0.0 }
  0x79   :  { %v1201_v6 = vunpack.c.l.bf16 %v1200_v53  ;;  %v220_v60 = vsub.f32 %v156_v32, %v188_v25  ;;  %v390_v19 = vadd.f32 1.0, %v654_v26  ;;  %v433_v13 = vmul.f32 0.6931472, %v656_v58  ;;  %v662_v34 = vpop.eup %661  ;;  %v103_v25 = vld [vmem:[#allocation5 + $0x78] sm:$0xff]  ;;  %v1206_v58 = vld [vmem:[#allocation14_spill] sm:$0xff] }
  0x7a   :  { %673 = vlog2.f32 %v388_v15  ;;  %v474_v38 = vadd.f32 %v429_v10, %v218_v43  ;;  %v503_v59 = vadd.f32 %v502_v21, %v472_v35  ;;  %v159_v29 = vmax.f32 %v821_v40, 0.0 }
  0x7b   :  { %v190_v48 = vmul.f32 %v1201_v6, %v819_v39  ;;  %v1202_v16 = vunpack.c.h.bf16 %v1200_v53  ;;  %v221_v50 = vsub.f32 %v157_v27, %v189_v3  ;;  %v391_v61 = vadd.f32 1.0, %v658_v7  ;;  %v664_v47 = vpop.eup %663 }
  0x7c   :  { %v435_v37 = vmul.f32 0.6931472, %v660_v2  ;;  %675 = vlog2.f32 %v389_v11  ;;  %v475_v51 = vadd.f32 %v431_v28, %v219_v56  ;;  %v504_v39 = vadd.f32 %v503_v59, %v473_v36  ;;  %v1207_v36 = vld [vmem:[#allocation15_spill] sm:$0xff] }
  0x7d   :  { %v191_v55 = vmul.f32 %v1202_v16, %v821_v40  ;;  %v130_v49 = vunpack.c.l.bf16 %v101_v54  ;;  %v160_v23 = vmax.f32 %v823_v41, 0.0  ;;  %v1204_v31 = vunpack.c.l.bf16 %v1203_v62 }
  0x7e   :  { %v222_v30 = vsub.f32 %v158_v57, %v190_v48  ;;  %v437_v9 = vmul.f32 0.6931472, %v662_v34  ;;  %677 = vlog2.f32 %v390_v19  ;;  %v476_v17 = vadd.f32 %v433_v13, %v220_v60  ;;  %v666_v5 = vpop.eup %665  ;;  %v1208_v19 = vld [vmem:[#allocation16_spill] sm:$0xff] }
  0x7f   :  { %v192_v46 = vmul.f32 %v1204_v31, %v823_v41  ;;  %v505_v40 = vadd.f32 %v504_v39, %v474_v38  ;;  %v131_v24 = vunpack.c.h.bf16 %v101_v54  ;;  %v161_v33 = vmax.f32 %v829_v44, 0.0 }
  0x80   :  { %v1205_v8 = vunpack.c.h.bf16 %v1203_v62  ;;  %v223_v18 = vsub.f32 %v159_v29, %v191_v55  ;;  %v439_v1 = vmul.f32 0.6931472, %v664_v47  ;;  %679 = vlog2.f32 %v391_v61  ;;  %v668_v41 = vpop.eup %667  ;;  %v1209_v55 = vld [vmem:[#allocation17_spill] sm:$0xff] }
  0x81   :  { %v477_v42 = vadd.f32 %v435_v37, %v221_v50  ;;  %v506_v0 = vadd.f32 %v505_v40, %v475_v51  ;;  %v132_v32 = vunpack.c.l.bf16 %v102_v22  ;;  %v162_v20 = vmax.f32 %v831_v45, 0.0 }
  0x82   :  { %v193_v14 = vmul.f32 %v1205_v8, %v829_v44  ;;  %v194_v12 = vmul.f32 %v130_v49, %v831_v45  ;;  %v224_v43 = vsub.f32 %v160_v23, %v192_v46  ;;  %v441_v15 = vmul.f32 0.6931472, %v666_v5  ;;  %v670_v35 = vpop.eup %669 }
  0x83   :  { %v478_v26 = vadd.f32 %v437_v9, %v222_v30  ;;  %v507_v10 = vadd.f32 %v506_v0, %v476_v17  ;;  %v133_v63 = vunpack.c.h.bf16 %v102_v22  ;;  %v163_v44 = vmax.f32 %v1206_v58, 0.0 }
  0x84   :  { %v195_v27 = vmul.f32 %v131_v24, %v1206_v58  ;;  %v225_v4 = vsub.f32 %v161_v33, %v193_v14  ;;  %v443_v3 = vmul.f32 0.6931472, %v668_v41  ;;  %v479_v56 = vadd.f32 %v439_v1, %v223_v18  ;;  %v672_v7 = vpop.eup %671 }
  0x85   :  { %v508_v11 = vadd.f32 %v507_v10, %v477_v42  ;;  %v134_v28 = vunpack.c.l.bf16 %v103_v25  ;;  %v164_v21 = vmax.f32 %v1207_v36, 0.0  ;;  %v196_v45 = vmul.f32 %v132_v32, %v1207_v36 }
  0x86   :  { %v226_v2 = vsub.f32 %v162_v20, %v194_v12  ;;  %v445_v57 = vmul.f32 0.6931472, %v670_v35  ;;  %v480_v53 = vadd.f32 %v441_v15, %v224_v43  ;;  %v135_v60 = vunpack.c.h.bf16 %v103_v25 }
  0x87   :  { %v509_v6 = vadd.f32 %v508_v11, %v478_v26  ;;  %v674_v48 = vpop.eup %673  ;;  %v165_v54 = vmax.f32 %v1208_v19, 0.0  ;;  %v197_v13 = vmul.f32 %v133_v63, %v1208_v19  ;;  %v227_v38 = vsub.f32 %v163_v44, %v195_v27 }
  0x88   :  { %v447_v59 = vmul.f32 0.6931472, %v672_v7  ;;  %v481_v34 = vadd.f32 %v443_v3, %v225_v4  ;;  %v166_v50 = vmax.f32 %v1209_v55, 0.0  ;;  %v198_v61 = vmul.f32 %v134_v28, %v1209_v55 }
  0x89   :  { %v510_v29 = vadd.f32 %v509_v6, %v479_v56  ;;  %v676_v16 = vpop.eup %675  ;;  %v228_v37 = vsub.f32 %v164_v21, %v196_v45  ;;  %v449_v51 = vmul.f32 0.6931472, %v674_v48  ;;  %v482_v39 = vadd.f32 %v445_v57, %v226_v2 }
  0x8a   :  { %v167_v23 = vmax.f32 %v845_v52, 0.0  ;;  %v199_v62 = vmul.f32 %v135_v60, %v845_v52  ;;  %v229_v31 = vsub.f32 %v165_v54, %v197_v13  ;;  %v451_v46 = vmul.f32 0.6931472, %v676_v16 }
  0x8b   :  { %v511_v47 = vadd.f32 %v510_v29, %v480_v53  ;;  %v678_v49 = vpop.eup %677  ;;  %v483_v30 = vadd.f32 %v447_v59, %v227_v38  ;;  %v230_v17 = vsub.f32 %v166_v50, %v198_v61  ;;  %v484_v5 = vadd.f32 %v449_v51, %v228_v37 }
  0x8c   :  { %v453_v40 = vmul.f32 0.6931472, %v678_v49  ;;  %v231_v33 = vsub.f32 %v167_v23, %v199_v62  ;;  %v485_v14 = vadd.f32 %v451_v46, %v229_v31 }
  0x8d   :  { %v512_v22 = vadd.f32 %v511_v47, %v481_v34  ;;  %v680_v9 = vpop.eup %679 }
  0x8e   :  { %v455_v8 = vmul.f32 0.6931472, %v680_v9  ;;  %v486_v1 = vadd.f32 %v453_v40, %v230_v17 }
  0x8f   :  { %v513_v24 = vadd.f32 %v512_v22, %v482_v39 }
  0x90   :  { %v487_v0 = vadd.f32 %v455_v8, %v231_v33 }
  0x91   :  { %v514_v18 = vadd.f32 %v513_v24, %v483_v30 }
  0x93   :  { %v515_v42 = vadd.f32 %v514_v18, %v484_v5 }
  0x95   :  { %v516_v41 = vadd.f32 %v515_v42, %v485_v14 }
  0x97   :  { %v517_v32 = vadd.f32 %v516_v41, %v486_v1 }
  0x99   :  { %v518_v20 = vadd.f32 %v517_v32, %v487_v0 }
  0x9b   :  { %519 = vadd.xlane.f32.xlu0 %v518_v20 }
 0x124   :  { %v520_v52 = vpop.xlane.xlu0 %519 }
 0x125   :  { %v521_v12 = vrot.slane %v520_v52, 4 }
 0x127   :  { %v522_v25 = vadd.f32 %v521_v12, %v520_v52 }
 0x129   :  { %v523_v43 = vrot.slane %v522_v25, 2 }
 0x12b   :  { %v524_v15 = vadd.f32 %v523_v43, %v522_v25 }
 0x12d   :  { %v525_v26 = vrot.slane %v524_v15, 1 }
 0x12f   :  { %v526_v10 = vadd.f32 %v525_v26, %v524_v15 }
 0x131   :  { %546 = vpush %v526_v10 }
 0x162   :  { %s547_s21 = spop %546 }
 0x163   :  { %v528_v35 = vstv %s547_s21 }
 0x164   :  { %529 = vst [vmem:[#allocation7] sm:$0xff] %v528_v35 }
 0x165   :  { %732 = shalt.err (!%p729_p0)
}
 0x166   :  { %539 = dma.vmem_to_hbm [thread:$0]  %s537_s1, 128, %s1118_s2, [#allocation4]  }
 0x167   :  { %745 = dma.done.wait [#allocation4], 128  }
 0x168   :  { %746 = vsyncadd [#allocation4], 4294967168 }
 0x169   :  { %543 = vsyncpa [#allocation3], 1 }
 0x16a   :  { %544 = vsyncpa [#allocation6], 1 }
 0x16b   :  { %545 = vsyncpa [#allocation4], 1 }

</bundles_post_ra>
